<compile_context>
chip_gen: v5e
topology: v5e:2x2
jax: 0.10.0
libtpu: 0.0.40
codegen_flags: <defaults>
</compile_context>

<pallas_src>
import functools

import jax
import jax.numpy as jnp
from jax.experimental import pallas as pl
from jax.experimental.pallas import tpu as pltpu

LANE = 128  # TPU lane width; all padded feature dims use this.


def _round_up(x, m):
    return ((x + m - 1) // m) * m


def _choose_batch_tile(batch, tile_b):
    """Pick the batch tile.

    Tile is a multiple of 8 sublanes, <= tile_b, and yields an even number of
    grid steps (>= 2) whenever the batch spans more than one sublane group so
    dimension_semantics=("parallel",) keeps both v7x TensorCores busy with a
    balanced split (essentially free on single-core v5e/v6e: one extra ~0.35us
    grid step at most).
    """
    b8 = _round_up(max(batch, 1), 8)
    tb = max(8, (min(tile_b, b8) // 8) * 8)
    steps = _round_up(b8, tb) // tb
    if b8 > 8 and steps % 2 == 1:
        target = steps + 1                                   # next even count
        tb = max(8, min(tb, _round_up(-(-b8 // target), 8)))
        steps = _round_up(b8, tb) // tb
    padded_b = _round_up(batch, tb)
    return tb, padded_b


def qnetwork_kernel(x_ref, w_ref, b_ref, out_ref, *, seg0, lane):
    """Fused fc1+relu, fc2+relu, fc3 on one (TILE_B, ...) batch tile.

    w_ref is the packed weight slab (seg0 + 2*lane, lane); slices below start
    at multiples of 16 rows, so they never split a packed sublane tile for
    either f32 (8,128) or bf16 (16,128) storage.
    """
    cdt = w_ref.dtype                           # MXU input dtype (f32 or bf16)

    x = x_ref[...]                              # (TILE_B, seg0), zero-padded
    b = b_ref[...].astype(jnp.float32)          # (3, lane); epilogue in f32

    w1 = w_ref[0:seg0, :]                       # (seg0, lane)
    w2 = w_ref[seg0:seg0 + lane, :]             # (lane, lane)
    w3 = w_ref[seg0 + lane:seg0 + 2 * lane, :]  # (lane, lane)

    h1 = jnp.dot(x.astype(cdt), w1, preferred_element_type=jnp.float32)
    h1 = jnp.maximum(h1 + b[0:1, :], 0.0)

    h2 = jnp.dot(h1.astype(cdt), w2, preferred_element_type=jnp.float32)
    h2 = jnp.maximum(h2 + b[1:2, :], 0.0)

    q = jnp.dot(h2.astype(cdt), w3, preferred_element_type=jnp.float32)
    out_ref[...] = (q + b[2:3, :]).astype(out_ref.dtype)


def qnetwork_forward(state, w_slab, b_slab, action_size, *, tile_b=512,
                     out_dtype=jnp.float32):
    """state: (B, state_size) f32. Returns (B, action_size) f32 Q-values.

    w_slab/b_slab come from pack_params() (pack once, reuse every call).
    out_dtype=jnp.bfloat16 halves the padded 128-lane HBM writeback for
    large-batch eval; the returned sliced Q-values are always cast back to f32.
    """
    batch, state_size = state.shape
    slab_rows, lane = w_slab.shape
    seg0 = slab_rows - 2 * lane          # rows allotted to fc1 in the slab (16)

    tb, padded_b = _choose_batch_tile(batch, tile_b)

    # Zero-pad batch (sublane) and feature (contraction) dims; zeros do not
    # perturb the matmuls and padded rows/cols are sliced away below.
    state = jnp.pad(state, ((0, padded_b - batch), (0, seg0 - state_size)))

    kernel = functools.partial(qnetwork_kernel, seg0=seg0, lane=lane)

    out = pl.pallas_call(
        kernel,
        out_shape=jax.ShapeDtypeStruct((padded_b, lane), out_dtype),
        grid=(padded_b // tb,),
        in_specs=[
            # State: tiled along batch, double-buffered by the auto-pipeliner.
            pl.BlockSpec((tb, seg0), lambda i: (i, 0)),
            # Weight slab / bias slab: constant index_map -> DMA'd once and
            # kept resident across all grid steps.
            pl.BlockSpec((slab_rows, lane), lambda i: (0, 0)),
            pl.BlockSpec((3, lane), lambda i: (0, 0)),
        ],
        # Lane-dense (TILE_B, 128) output slab -> unmasked vst stores.
        out_specs=pl.BlockSpec((tb, lane), lambda i: (i, 0)),
        compiler_params=pltpu.CompilerParams(
            dimension_semantics=("parallel",),
        ),
    )(state, w_slab, b_slab)

    return out[:batch, :action_size].astype(jnp.float32)


def init_params(key, state_size=8, action_size=4, hidden=64):
    """Unpadded params mimicking nn.Linear default init (U(+/- 1/sqrt(fan_in)))."""
    keys = jax.random.split(key, 6)

    def linear(kw, kb, fan_in, fan_out):
        bound = 1.0 / jnp.sqrt(fan_in)
        w = jax.random.uniform(kw, (fan_in, fan_out), jnp.float32, -bound, bound)
        b = jax.random.uniform(kb, (1, fan_out), jnp.float32, -bound, bound)
        return w, b

    w1, b1 = linear(keys[0], keys[1], state_size, hidden)
    w2, b2 = linear(keys[2], keys[3], hidden, hidden)
    w3, b3 = linear(keys[4], keys[5], hidden, action_size)
    return {"w1": w1, "b1": b1, "w2": w2, "b2": b2, "w3": w3, "b3": b3}


def pack_params(params, lane=LANE, weight_dtype=jnp.float32):
    """Zero-pad lane dims to `lane`, pack weights/biases into 2 slabs.

    Do this ONCE; the returned device arrays are reused across forward calls.
    Segment starts are 16-row aligned so bf16 (16,128) packed tiles are never
    split by the kernel's static slices. weight_dtype=jnp.bfloat16 is the
    recommended storage on v6e/v7x (halves the weight DMA, native bf16 MXU
    issue, f32 accumulation); the f32 default matches the reference exactly.
    """
    w1, b1 = params["w1"], params["b1"]
    w2, b2 = params["w2"], params["b2"]
    w3, b3 = params["w3"], params["b3"]
    state_size = w1.shape[0]
    seg0 = _round_up(state_size, 16)

    def pad_w(w, rows):
        return jnp.pad(w, ((0, rows - w.shape[0]), (0, lane - w.shape[1])))

    def pad_b(b):
        return jnp.pad(b, ((0, 0), (0, lane - b.shape[1])))

    w_slab = jnp.concatenate(
        [pad_w(w1, seg0), pad_w(w2, lane), pad_w(w3, lane)], axis=0
    ).astype(weight_dtype)                       # (seg0 + 2*lane, lane) = (272, 128)
    b_slab = jnp.concatenate(
        [pad_b(b1), pad_b(b2), pad_b(b3)], axis=0
    ).astype(jnp.float32)                        # (3, lane)
    return w_slab, b_slab


def reference_forward(state, params):
    h1 = jnp.maximum(state @ params["w1"] + params["b1"], 0.0)
    h2 = jnp.maximum(h1 @ params["w2"] + params["b2"], 0.0)
    return h2 @ params["w3"] + params["b3"]


if __name__ == "__main__":
    key = jax.random.PRNGKey(0)
    k_params, k_state, k_big = jax.random.split(key, 3)

    state_size, action_size, batch = 8, 4, 2
    params = init_params(k_params, state_size=state_size, action_size=action_size)

    # Pack once; device arrays are reused across every forward call.
    w_slab, b_slab = pack_params(params)                                # f32 (exact)
    w_slab_bf, b_slab_bf = pack_params(params, weight_dtype=jnp.bfloat16)  # v6e/v7x path

    # ---- Small acting-style batch (overhead/DMA-bound regime). ----
    state = jax.random.normal(k_state, (batch, state_size), jnp.float32)
    ref = reference_forward(state, params)

    q = jax.block_until_ready(qnetwork_forward(state, w_slab, b_slab, action_size))
    assert q.shape == (batch, action_size)
    # f32 path is normally ~1e-5 from the reference; the loose bound covers the
    # (chip/compiler-dependent) bf16-pass default MXU precision for f32 matmuls.
    assert jnp.allclose(q, ref, atol=1e-2, rtol=1e-2), (q, ref)

    q_bf = jax.block_until_ready(
        qnetwork_forward(state, w_slab_bf, b_slab_bf, action_size))
    assert jnp.allclose(q_bf, ref, atol=5e-2, rtol=5e-2), (q_bf, ref)

    # ---- Larger ragged batch: exercises batch tiling/padding and the even
    # >=2-step grid (balanced across v7x's two TensorCores). ----
    big_batch = 300
    big_state = jax.random.normal(k_big, (big_batch, state_size), jnp.float32)
    ref_big = reference_forward(big_state, params)

    q_big = jax.block_until_ready(
        qnetwork_forward(big_state, w_slab, b_slab, action_size, tile_b=512))
    assert q_big.shape == (big_batch, action_size)
    assert jnp.allclose(q_big, ref_big, atol=1e-2, rtol=1e-2)

    # bf16 weights + bf16 output slab (halved weight DMA and HBM writeback).
    q_big_bf = jax.block_until_ready(
        qnetwork_forward(big_state, w_slab_bf, b_slab_bf, action_size,
                         tile_b=512, out_dtype=jnp.bfloat16))
    assert jnp.allclose(q_big_bf, ref_big, atol=5e-2, rtol=5e-2)

    print("KERNEL_OK")
</pallas_src>

<mosaic_0001>
module attributes {stable_mosaic.version = 11 : i64} {
  func.func @qnetwork_kernel(%arg0: i32, %arg1: memref<8x16xf32, #tpu.memory_space<vmem>>, %arg2: memref<272x128xf32, #tpu.memory_space<vmem>>, %arg3: memref<3x128xf32, #tpu.memory_space<vmem>>, %arg4: memref<8x128xf32, #tpu.memory_space<vmem>>) attributes {dimension_semantics = [#tpu.dimension_semantics<parallel>], iteration_bounds = array<i64: 1>, scalar_prefetch = 0 : i64, scratch_operands = 0 : i64, tpu.core_type = #tpu.core_type<tc>, window_params = [{transform_indices = @transform_0, window_bounds = array<i64: 8, 16>}, {pipeline_mode = #tpu.pipeline_mode<synchronous>, transform_indices = @transform_1, window_bounds = array<i64: 272, 128>}, {pipeline_mode = #tpu.pipeline_mode<synchronous>, transform_indices = @transform_2, window_bounds = array<i64: 3, 128>}, {transform_indices = @transform_3, window_bounds = array<i64: 8, 128>}]} {
    %c0 = arith.constant 0 : index
    %c0_0 = arith.constant 0 : index
    %0 = vector.load %arg1[%c0, %c0_0] : memref<8x16xf32, #tpu.memory_space<vmem>>, vector<8x16xf32>
    %c0_1 = arith.constant 0 : index
    %c0_2 = arith.constant 0 : index
    %1 = vector.load %arg3[%c0_1, %c0_2] : memref<3x128xf32, #tpu.memory_space<vmem>>, vector<3x128xf32>
    %c0_3 = arith.constant 0 : index
    %c0_4 = arith.constant 0 : index
    %2 = vector.load %arg2[%c0_3, %c0_4] : memref<272x128xf32, #tpu.memory_space<vmem>>, vector<16x128xf32>
    %c16 = arith.constant 16 : index
    %c0_5 = arith.constant 0 : index
    %3 = vector.load %arg2[%c16, %c0_5] : memref<272x128xf32, #tpu.memory_space<vmem>>, vector<128x128xf32>
    %c144 = arith.constant 144 : index
    %c0_6 = arith.constant 0 : index
    %4 = vector.load %arg2[%c144, %c0_6] : memref<272x128xf32, #tpu.memory_space<vmem>>, vector<128x128xf32>
    %cst = arith.constant dense<0.000000e+00> : vector<8x128xf32>
    %5 = tpu.matmul %0, %2, %cst {dimension_numbers = #tpu.dot_dimension_numbers<[1], [0], [0], [1], [0, 0, 1, 1], [], []>} : vector<8x16xf32>, vector<16x128xf32>, vector<8x128xf32> -> vector<8x128xf32>
    %6 = vector.extract_strided_slice %1 {offsets = [0, 0], sizes = [1, 128], strides = [1, 1]} : vector<3x128xf32> to vector<1x128xf32>
    %7 = vector.broadcast %6 : vector<1x128xf32> to vector<8x128xf32>
    %8 = arith.addf %5, %7 : vector<8x128xf32>
    %cst_7 = arith.constant 0.000000e+00 : f32
    %9 = vector.broadcast %cst_7 : f32 to vector<8x128xf32>
    %10 = arith.maximumf %8, %9 : vector<8x128xf32>
    %cst_8 = arith.constant dense<0.000000e+00> : vector<8x128xf32>
    %11 = tpu.matmul %10, %3, %cst_8 {dimension_numbers = #tpu.dot_dimension_numbers<[1], [0], [0], [1], [0, 0, 1, 1], [], []>} : vector<8x128xf32>, vector<128x128xf32>, vector<8x128xf32> -> vector<8x128xf32>
    %12 = vector.extract_strided_slice %1 {offsets = [1, 0], sizes = [1, 128], strides = [1, 1]} : vector<3x128xf32> to vector<1x128xf32>
    %13 = vector.broadcast %12 : vector<1x128xf32> to vector<8x128xf32>
    %14 = arith.addf %11, %13 : vector<8x128xf32>
    %cst_9 = arith.constant 0.000000e+00 : f32
    %15 = vector.broadcast %cst_9 : f32 to vector<8x128xf32>
    %16 = arith.maximumf %14, %15 : vector<8x128xf32>
    %cst_10 = arith.constant dense<0.000000e+00> : vector<8x128xf32>
    %17 = tpu.matmul %16, %4, %cst_10 {dimension_numbers = #tpu.dot_dimension_numbers<[1], [0], [0], [1], [0, 0, 1, 1], [], []>} : vector<8x128xf32>, vector<128x128xf32>, vector<8x128xf32> -> vector<8x128xf32>
    %18 = vector.extract_strided_slice %1 {offsets = [2, 0], sizes = [1, 128], strides = [1, 1]} : vector<3x128xf32> to vector<1x128xf32>
    %19 = vector.broadcast %18 : vector<1x128xf32> to vector<8x128xf32>
    %20 = arith.addf %17, %19 : vector<8x128xf32>
    %c0_11 = arith.constant 0 : index
    %c0_12 = arith.constant 0 : index
    %21 = vector.load %arg4[%c0_11, %c0_12] : memref<8x128xf32, #tpu.memory_space<vmem>>, vector<8x128xf32>
    tpu.vector_store %arg4[%c0_11, %c0_12], %20 {strides = array<i32>} : memref<8x128xf32, #tpu.memory_space<vmem>>, vector<8x128xf32>,
    return
  }
  func.func @transform_0(%arg0: i32) -> (i32, i32) {
    %c0_i32 = arith.constant 0 : i32
    %c0_i32_0 = arith.constant 0 : i32
    return %arg0, %c0_i32 : i32, i32
  }
  func.func @transform_1(%arg0: i32) -> (i32, i32) {
    %c0_i32 = arith.constant 0 : i32
    %c0_i32_0 = arith.constant 0 : i32
    %c0_i32_1 = arith.constant 0 : i32
    return %c0_i32, %c0_i32_0 : i32, i32
  }
  func.func @transform_2(%arg0: i32) -> (i32, i32) {
    %c0_i32 = arith.constant 0 : i32
    %c0_i32_0 = arith.constant 0 : i32
    %c0_i32_1 = arith.constant 0 : i32
    return %c0_i32, %c0_i32_0 : i32, i32
  }
  func.func @transform_3(%arg0: i32) -> (i32, i32) {
    %c0_i32 = arith.constant 0 : i32
    %c0_i32_0 = arith.constant 0 : i32
    return %arg0, %c0_i32 : i32, i32
  }
}

</mosaic_0001>

<bundles_post_ra>
// kernel: tpu_custom_call.1
= control target key start
LH: loop header
LB: loop body
LE: loop exit
PB: predicated region body
PF: predicated region fallthrough
CT: control target
= control target key end

     0   :  { %8 = vsyncpa [#allocation3], 0  ;;  %s329_s0 = inlined_call_operand.hbm [shape: f32[8,16], index: 0, kind: input, shape index: {}]   ;;  %s330_s1 = inlined_call_operand.hbm [shape: f32[272,128], index: 1, kind: input, shape index: {}]   ;;  %s331_s2 = inlined_call_operand.hbm [shape: f32[3,128], index: 2, kind: input, shape index: {}]   ;;  %s332_s3 = inlined_call_operand.hbm [shape: f32[8,128], index: 3, kind: output, shape index: {}]  }
   0x1   :  { %9 = vsyncpa [#allocation6], 0  ;;  %s26_s14 = sshll.u32 %s330_s1, 4  ;;  %s27_s14 = int_to_ptr.hbm [resolvable:$true] %s26_s14 }
   0x2   :  { %10 = vsyncpa [#allocation4], 0  ;;  %s291_s15 = smov [#allocation5]   ;;  %s16_s19 = sshll.u32 %s329_s0, 4  ;;  %s17_s19 = int_to_ptr.hbm [resolvable:$true] %s16_s19 }
   0x3   :  { %s28_s16 = sshll.u32 %s291_s15, 4  ;;  %s292_s20 = smov 128   ;;  %s29_s16 = int_to_ptr.vmem [resolvable:$true] %s28_s16 }
   0x4   :  { %s293_s21 = smov 8   ;;  %s294_s22 = smov [#allocation2]  }
   0x5   :  { %34 = dma.hbm_to_vmem [thread:$0]  %s27_s14, 4352, %s29_s16, [#allocation6], %s292_s20, %s292_s20, %s293_s21  }
   0x6   :  { %s18_s23 = sshll.u32 %s294_s22, 4  ;;  %s40_s26 = sshll.u32 %s331_s2, 4  ;;  %s19_s23 = int_to_ptr.vmem [resolvable:$true] %s18_s23  ;;  %s41_s26 = int_to_ptr.hbm [resolvable:$true] %s40_s26 }
   0x7   :  { %21 = dma.hbm_to_vmem [thread:$0]  %s17_s19, 128, %s19_s23, [#allocation3]  }
   0x8   :  { %s295_s1 = smov [#allocation7]  }
   0x9   :  { %s42_s27 = sshll.u32 %s295_s1, 4  ;;  %s43_s27 = int_to_ptr.vmem [resolvable:$true] %s42_s27 }
   0xa   :  { %45 = dma.hbm_to_vmem [thread:$0]  %s41_s26, 64, %s43_s27, [#allocation6]  }
   0xb   :  { %285 = dma.done.wait [#allocation3], 128  }
   0xc   :  { %286 = vsyncadd [#allocation3], 4294967168 }
   0xd   :  { %287 = dma.done.wait [#allocation6], 4416  }
   0xe   :  { %288 = vsyncadd [#allocation6], 4294962880  ;;  %v61_v0 = vld [vmem:[#allocation5 + $0x8] sm:$0xff]  ;;  %v60_v1 = vld [vmem:[#allocation5] sm:$0xff]  ;;  %vm95_vm0 = vcmask 130048   ;;  %s296_s0 = smov [#allocation8]  }
   0xf   :  { %113 = vmatpush.msra.mxu0 %v61_v0  ;;  %v58_v2 = vld [vmem:[#allocation2] sm:$0xff]  ;;  %v77_v3 = vld [vmem:[#allocation5 + $0x88] sm:$0xff]  ;;  %v76_v4 = vld [vmem:[#allocation5 + $0x80] sm:$0xff]  ;;  %s169_s2 = sshll.u32 %s296_s0, 4  ;;  %s171_s30 = sshll.u32 %s332_s3, 4  ;;  %s170_s2 = int_to_ptr.vmem [resolvable:$true] %s169_s2  ;;  %s172_s30 = int_to_ptr.hbm [resolvable:$true] %s171_s30 }
  0x10   :  { %121 = vmatpush.msra.mxu1 %v77_v3  ;;  %v75_v5 = vld [vmem:[#allocation5 + $0x78] sm:$0xff]  ;;  %v74_v6 = vld [vmem:[#allocation5 + $0x70] sm:$0xff]  ;;  %v73_v7 = vld [vmem:[#allocation5 + $0x68] sm:$0xff] }
  0x11   :  { %114 = vmatpush.msra.mxu0 %v60_v1  ;;  %v72_v8 = vld [vmem:[#allocation5 + $0x60] sm:$0xff]  ;;  %v71_v9 = vld [vmem:[#allocation5 + $0x58] sm:$0xff]  ;;  %v70_v10 = vld [vmem:[#allocation5 + $0x50] sm:$0xff] }
  0x12   :  { %182 = vmatmul.msk.f32.vlgmr.msra.gmra.mxu0 %vm95_vm0, %v58_v2  ;;  %122 = vmatpush.msra.mxu1 %v76_v4  ;;  %v69_v11 = vld [vmem:[#allocation5 + $0x48] sm:$0xff]  ;;  %v68_v12 = vld [vmem:[#allocation5 + $0x40] sm:$0xff]  ;;  %v67_v13 = vld [vmem:[#allocation5 + $0x38] sm:$0xff] }
  0x13   :  { %v66_v14 = vld [vmem:[#allocation5 + $0x30] sm:$0xff]  ;;  %v65_v15 = vld [vmem:[#allocation5 + $0x28] sm:$0xff]  ;;  %v64_v16 = vld [vmem:[#allocation5 + $0x20] sm:$0xff] }
  0x14   :  { %123 = vmatpush.msra.mxu1 %v75_v5  ;;  %v63_v17 = vld [vmem:[#allocation5 + $0x18] sm:$0xff]  ;;  %v62_v18 = vld [vmem:[#allocation5 + $0x10] sm:$0xff]  ;;  %v93_v19 = vld [vmem:[#allocation5 + $0x108] sm:$0xff] }
  0x15   :  { %v92_v20 = vld [vmem:[#allocation5 + $0x100] sm:$0xff]  ;;  %143 = vmatpush.msra.mxu2 %v93_v19  ;;  %v91_v21 = vld [vmem:[#allocation5 + $0xf8] sm:$0xff]  ;;  %v90_v22 = vld [vmem:[#allocation5 + $0xf0] sm:$0xff] }
  0x16   :  { %124 = vmatpush.msra.mxu1 %v74_v6  ;;  %v89_v23 = vld [vmem:[#allocation5 + $0xe8] sm:$0xff]  ;;  %v88_v24 = vld [vmem:[#allocation5 + $0xe0] sm:$0xff]  ;;  %v87_v25 = vld [vmem:[#allocation5 + $0xd8] sm:$0xff] }
  0x17   :  { %144 = vmatpush.msra.mxu2 %v92_v20  ;;  %v86_v26 = vld [vmem:[#allocation5 + $0xd0] sm:$0xff]  ;;  %v85_v27 = vld [vmem:[#allocation5 + $0xc8] sm:$0xff]  ;;  %v84_v28 = vld [vmem:[#allocation5 + $0xc0] sm:$0xff] }
  0x18   :  { %125 = vmatpush.msra.mxu1 %v73_v7  ;;  %v83_v29 = vld [vmem:[#allocation5 + $0xb8] sm:$0xff]  ;;  %v82_v30 = vld [vmem:[#allocation5 + $0xb0] sm:$0xff]  ;;  %v81_v32 = vld [vmem:[#allocation5 + $0xa8] sm:$0xff] }
  0x19   :  { %145 = vmatpush.msra.mxu2 %v91_v21  ;;  %v59_v31 = vld [vmem:[#allocation7] sm:$0x7]  ;;  %v80_v37 = vld [vmem:[#allocation5 + $0xa0] sm:$0xff]  ;;  %v79_v38 = vld [vmem:[#allocation5 + $0x98] sm:$0xff] }
  0x1a   :  { %126 = vmatpush.msra.mxu1 %v72_v8  ;;  %v94_v33 = vperm.slane %v59_v31, 0  ;;  %v78_v39 = vld [vmem:[#allocation5 + $0x90] sm:$0xff]  ;;  %v120_v40 = vperm.slane %v59_v31, 1  ;;  %v142_v44 = vperm.slane %v59_v31, 2 }
  0x1b   :  { %146 = vmatpush.msra.mxu2 %v90_v22 }
  0x1c   :  { %127 = vmatpush.msra.mxu1 %v71_v9 }
  0x1d   :  { %147 = vmatpush.msra.mxu2 %v89_v23 }
  0x1e   :  { %128 = vmatpush.msra.mxu1 %v70_v10 }
  0x1f   :  { %148 = vmatpush.msra.mxu2 %v88_v24 }
  0x20   :  { %129 = vmatpush.msra.mxu1 %v69_v11 }
  0x21   :  { %149 = vmatpush.msra.mxu2 %v87_v25 }
  0x22   :  { %130 = vmatpush.msra.mxu1 %v68_v12 }
  0x23   :  { %150 = vmatpush.msra.mxu2 %v86_v26 }
  0x24   :  { %131 = vmatpush.msra.mxu1 %v67_v13 }
  0x25   :  { %151 = vmatpush.msra.mxu2 %v85_v27 }
  0x26   :  { %132 = vmatpush.msra.mxu1 %v66_v14 }
  0x27   :  { %152 = vmatpush.msra.mxu2 %v84_v28 }
  0x28   :  { %133 = vmatpush.msra.mxu1 %v65_v15 }
  0x29   :  { %153 = vmatpush.msra.mxu2 %v83_v29 }
  0x2a   :  { %134 = vmatpush.msra.mxu1 %v64_v16 }
  0x2b   :  { %154 = vmatpush.msra.mxu2 %v82_v30 }
  0x2c   :  { %135 = vmatpush.msra.mxu1 %v63_v17 }
  0x2d   :  { %155 = vmatpush.msra.mxu2 %v81_v32 }
  0x2e   :  { %136 = vmatpush.msra.mxu1 %v62_v18 }
  0x2f   :  { %156 = vmatpush.msra.mxu2 %v80_v37 }
  0x31   :  { %157 = vmatpush.msra.mxu2 %v79_v38 }
  0x33   :  { %158 = vmatpush.msra.mxu2 %v78_v39 }
  0x8f   :  { %v116_v34 = vpop.f32.mrf.mxu0 }
  0x90   :  { %v117_v35 = vadd.f32 %v116_v34, %v94_v33 }
  0x92   :  { %v119_v36 = vmax.f32 %v117_v35, 0.0 }
  0x94   :  { %137 = vmatmul.f32.vlgmr.msra.gmra.mxu1 %v119_v36 }
 0x111   :  { %v138_v41 = vpop.f32.mrf.mxu1 }
 0x112   :  { %v139_v42 = vadd.f32 %v138_v41, %v120_v40 }
 0x114   :  { %v141_v43 = vmax.f32 %v139_v42, 0.0 }
 0x116   :  { %159 = vmatmul.f32.vlgmr.msra.gmra.mxu2 %v141_v43 }
 0x199   :  { %v160_v45 = vpop.f32.mrf.mxu2 }
 0x19a   :  { %v161_v46 = vadd.f32 %v160_v45, %v142_v44 }
 0x19c   :  { %163 = vst [vmem:[#allocation8] sm:$0xff] %v161_v46 }
 0x19d   :  { %174 = dma.vmem_to_hbm [thread:$0]  %s170_s2, 128, %s172_s30, [#allocation4]  }
 0x19e   :  { %289 = dma.done.wait [#allocation4], 128  }
 0x19f   :  { %290 = vsyncadd [#allocation4], 4294967168 }
 0x1a0   :  { %179 = vsyncpa [#allocation3], 1 }
 0x1a1   :  { %180 = vsyncpa [#allocation6], 1 }
 0x1a2   :  { %181 = vsyncpa [#allocation4], 1 }

</bundles_post_ra>
